<compile_context>
chip_gen: v7x
topology: tpu7x:2x2x1
jax: 0.10.0
libtpu: 0.0.40
codegen_flags: <defaults>
</compile_context>

<pallas_src>
import jax
import jax.numpy as jnp
from jax import lax
from jax.experimental import pallas as pl
from jax.experimental.pallas import tpu as pltpu

F_PAD = 128  # lane-pad every feature dim to one full vreg lane width


def gcn_fused_kernel(adj_ref, inv_deg_ref, x_ref, w_ref, b_ref, o_ref):
    """All SAGEConv layers fused: aggregate, stacked linear, L2-norm, ReLU."""
    adj = adj_ref[...]                      # [N, N]       bf16 (0/1 entries)
    inv_deg = inv_deg_ref[...]              # [N, 1]       f32  (1/max(deg,1))
    h = x_ref[...]                          # [N, F_PAD]   bf16 (zero-padded)
    num_layers = w_ref.shape[0]

    for li in range(num_layers):            # static unroll (L = 3)
        # Mean aggregation: (A @ h) scaled per-row by 1/deg, accumulate in f32.
        agg = jnp.dot(adj, h, preferred_element_type=jnp.float32) * inv_deg

        # Fused lin_l/lin_r: [agg | h] @ [[W_l];[W_r]]  (K = 2*F_PAD = 256).
        cat = jnp.concatenate([agg.astype(jnp.bfloat16), h], axis=-1)
        z = jnp.dot(cat, w_ref[li], preferred_element_type=jnp.float32)
        z = z + b_ref[li]                    # [1, F_PAD] bias, f32

        # F.normalize(z, p=2, dim=-1): z / max(||z||, eps)  ==  z * rsqrt(max(ss, eps^2))
        sumsq = jnp.sum(z * z, axis=-1, keepdims=True)
        z = z * lax.rsqrt(jnp.maximum(sumsq, 1e-24))

        if li < num_layers - 1:
            z = jnp.maximum(z, 0.0)          # ReLU (+ identity dropout in eval)
            h = z.astype(jnp.bfloat16)       # next layer's bf16 MXU operand
        else:
            o_ref[...] = z.astype(o_ref.dtype)   # final layer: write f32 result


def init_gcn_params(key, in_channels, hidden_channels, out_channels, num_layers):
    """Deterministic glorot-ish init matching SAGEConv parameter shapes.

    Each layer: W_l [f_in, f_out] (lin_l, with bias), W_r [f_in, f_out] (lin_r, no bias).
    """
    dims = [in_channels] + [hidden_channels] * (num_layers - 1) + [out_channels]
    params = []
    for li in range(num_layers):
        f_in, f_out = dims[li], dims[li + 1]
        key, k1, k2 = jax.random.split(key, 3)
        scale = 1.0 / jnp.sqrt(jnp.float32(f_in))
        w_l = jax.random.uniform(k1, (f_in, f_out), jnp.float32, -scale, scale)
        w_r = jax.random.uniform(k2, (f_in, f_out), jnp.float32, -scale, scale)
        b = jnp.zeros((1, f_out), jnp.float32)
        params.append((w_l, w_r, b))
    return params


def gcn_forward(x, adj, params, dropout=0.5, training=False):
    """Forward pass of GCN: SAGEConv+ReLU+Dropout for all but the last layer."""
    del dropout, training  # inference: dropout is identity
    n, f_in0 = x.shape
    num_layers = len(params)
    f_out_last = params[0 if num_layers == 0 else -1][0].shape[1]

    # Fold mean-aggregation normalization into the kernel via a 1/deg column
    # (deg clamped at 1 like PyG); no adj_norm materialized in HBM.
    deg = jnp.sum(adj, axis=1, keepdims=True)
    inv_deg = 1.0 / jnp.maximum(deg, 1.0)                         # [N, 1] f32

    adj_bf = adj.astype(jnp.bfloat16)                              # 0/1 exact in bf16
    x_pad = jnp.pad(x, ((0, 0), (0, F_PAD - f_in0))).astype(jnp.bfloat16)

    # Stack (and lane-pad) weights/biases: one DMA for each stack.
    w_stack, b_stack = [], []
    for (w_l, w_r, b) in params:
        f_in, f_out = w_l.shape
        assert f_in <= F_PAD and f_out <= F_PAD
        wl_p = jnp.pad(w_l, ((0, F_PAD - f_in), (0, F_PAD - f_out)))
        wr_p = jnp.pad(w_r, ((0, F_PAD - f_in), (0, F_PAD - f_out)))
        w_stack.append(jnp.concatenate([wl_p, wr_p], axis=0).astype(jnp.bfloat16))
        b_stack.append(jnp.pad(b.reshape(1, -1), ((0, 0), (0, F_PAD - f_out))))
    w_stack = jnp.stack(w_stack)            # [L, 2*F_PAD, F_PAD] bf16
    b_stack = jnp.stack(b_stack)            # [L, 1, F_PAD]       f32

    out_pad = pl.pallas_call(
        gcn_fused_kernel,
        out_shape=jax.ShapeDtypeStruct((n, F_PAD), jnp.float32),
        grid=(1,),
        in_specs=[
            pl.BlockSpec((n, n), lambda i: (0, 0)),                        # adj (bf16)
            pl.BlockSpec((n, 1), lambda i: (0, 0)),                        # 1/deg
            pl.BlockSpec((n, F_PAD), lambda i: (0, 0)),                    # x (padded bf16)
            pl.BlockSpec((num_layers, 2 * F_PAD, F_PAD), lambda i: (0, 0, 0)),  # W stack
            pl.BlockSpec((num_layers, 1, F_PAD), lambda i: (0, 0, 0)),     # bias stack
        ],
        out_specs=pl.BlockSpec((n, F_PAD), lambda i: (0, 0)),
        compiler_params=pltpu.CompilerParams(
            dimension_semantics=("arbitrary",)),
    )(adj_bf, inv_deg, x_pad, w_stack, b_stack)

    return out_pad[:, :f_out_last]


if __name__ == "__main__":
    # Small deterministic example.
    N = 64               # number of graph nodes
    IN_C = 16
    HID_C = 32
    OUT_C = 8
    NUM_LAYERS = 3
    DROPOUT = 0.5

    key = jax.random.PRNGKey(0)
    kx, kadj, kp = jax.random.split(key, 3)

    x = jax.random.normal(kx, (N, IN_C), jnp.float32)
    # Random symmetric-ish binary adjacency with self loops.
    adj = (jax.random.uniform(kadj, (N, N)) < 0.1).astype(jnp.float32)
    adj = jnp.maximum(adj, adj.T)
    adj = jnp.maximum(adj, jnp.eye(N, dtype=jnp.float32))

    params = init_gcn_params(kp, IN_C, HID_C, OUT_C, NUM_LAYERS)

    out = gcn_forward(x, adj, params, dropout=DROPOUT, training=False)
    out = jax.block_until_ready(out)
    assert out.shape == (N, OUT_C), out.shape
    assert bool(jnp.all(jnp.isfinite(out)))
    print("KERNEL_OK")
</pallas_src>

<mosaic_0001>
module attributes {stable_mosaic.version = 11 : i64} {
  func.func @gcn_fused_kernel(%arg0: i32, %arg1: memref<64x64xbf16, #tpu.memory_space<vmem>>, %arg2: memref<64x1xf32, #tpu.memory_space<vmem>>, %arg3: memref<64x128xbf16, #tpu.memory_space<vmem>>, %arg4: memref<3x256x128xbf16, #tpu.memory_space<vmem>>, %arg5: memref<3x1x128xf32, #tpu.memory_space<vmem>>, %arg6: memref<64x128xf32, #tpu.memory_space<vmem>>) attributes {dimension_semantics = [#tpu.dimension_semantics<arbitrary>], iteration_bounds = array<i64: 1>, scalar_prefetch = 0 : i64, scratch_operands = 0 : i64, tpu.core_type = #tpu.core_type<tc>, window_params = [{pipeline_mode = #tpu.pipeline_mode<synchronous>, transform_indices = @transform_0, window_bounds = array<i64: 64, 64>}, {pipeline_mode = #tpu.pipeline_mode<synchronous>, transform_indices = @transform_1, window_bounds = array<i64: 64, 1>}, {pipeline_mode = #tpu.pipeline_mode<synchronous>, transform_indices = @transform_2, window_bounds = array<i64: 64, 128>}, {pipeline_mode = #tpu.pipeline_mode<synchronous>, transform_indices = @transform_3, window_bounds = array<i64: 3, 256, 128>}, {pipeline_mode = #tpu.pipeline_mode<synchronous>, transform_indices = @transform_4, window_bounds = array<i64: 3, 1, 128>}, {pipeline_mode = #tpu.pipeline_mode<synchronous>, transform_indices = @transform_5, window_bounds = array<i64: 64, 128>}]} {
    %c0 = arith.constant 0 : index
    %c0_0 = arith.constant 0 : index
    %0 = vector.load %arg1[%c0, %c0_0] : memref<64x64xbf16, #tpu.memory_space<vmem>>, vector<64x64xbf16>
    %c0_1 = arith.constant 0 : index
    %c0_2 = arith.constant 0 : index
    %1 = vector.load %arg2[%c0_1, %c0_2] : memref<64x1xf32, #tpu.memory_space<vmem>>, vector<64x1xf32>
    %c0_3 = arith.constant 0 : index
    %c0_4 = arith.constant 0 : index
    %2 = vector.load %arg3[%c0_3, %c0_4] : memref<64x128xbf16, #tpu.memory_space<vmem>>, vector<64x128xbf16>
    %cst = arith.constant dense<0.000000e+00> : vector<64x128xf32>
    %3 = tpu.matmul %0, %2, %cst {dimension_numbers = #tpu.dot_dimension_numbers<[1], [0], [0], [1], [0, 0, 1, 1], [], []>} : vector<64x64xbf16>, vector<64x128xbf16>, vector<64x128xf32> -> vector<64x128xf32>
    %4 = vector.broadcast %1 : vector<64x1xf32> to vector<64x128xf32>
    %5 = arith.mulf %3, %4 : vector<64x128xf32>
    %6 = arith.truncf %5 : vector<64x128xf32> to vector<64x128xbf16>
    %7 = tpu.concatenate %6, %2 in 1 : vector<64x128xbf16>, vector<64x128xbf16> -> vector<64x256xbf16>
    %c0_5 = arith.constant 0 : index
    %c0_6 = arith.constant 0 : index
    %c0_7 = arith.constant 0 : index
    %8 = vector.load %arg4[%c0_5, %c0_6, %c0_7] : memref<3x256x128xbf16, #tpu.memory_space<vmem>>, vector<1x256x128xbf16>
    %9 = vector.shape_cast %8 : vector<1x256x128xbf16> to vector<256x128xbf16>
    %cst_8 = arith.constant dense<0.000000e+00> : vector<64x128xf32>
    %10 = tpu.matmul %7, %9, %cst_8 {dimension_numbers = #tpu.dot_dimension_numbers<[1], [0], [0], [1], [0, 0, 1, 1], [], []>} : vector<64x256xbf16>, vector<256x128xbf16>, vector<64x128xf32> -> vector<64x128xf32>
    %c0_9 = arith.constant 0 : index
    %c0_10 = arith.constant 0 : index
    %c0_11 = arith.constant 0 : index
    %11 = vector.load %arg5[%c0_9, %c0_10, %c0_11] : memref<3x1x128xf32, #tpu.memory_space<vmem>>, vector<1x1x128xf32>
    %12 = vector.shape_cast %11 : vector<1x1x128xf32> to vector<1x128xf32>
    %13 = vector.broadcast %12 : vector<1x128xf32> to vector<64x128xf32>
    %14 = arith.addf %10, %13 : vector<64x128xf32>
    %15 = arith.mulf %14, %14 : vector<64x128xf32>
    %cst_12 = arith.constant dense<0.000000e+00> : vector<64xf32>
    %16 = vector.multi_reduction <add>, %15, %cst_12 [1] : vector<64x128xf32> to vector<64xf32>
    %17 = vector.shape_cast %16 : vector<64xf32> to vector<64x1xf32>
    %cst_13 = arith.constant 1.000000e-24 : f32
    %18 = vector.broadcast %cst_13 : f32 to vector<64x1xf32>
    %19 = arith.maximumf %17, %18 : vector<64x1xf32>
    %20 = math.rsqrt %19 : vector<64x1xf32>
    %21 = vector.broadcast %20 : vector<64x1xf32> to vector<64x128xf32>
    %22 = arith.mulf %14, %21 : vector<64x128xf32>
    %cst_14 = arith.constant 0.000000e+00 : f32
    %23 = vector.broadcast %cst_14 : f32 to vector<64x128xf32>
    %24 = arith.maximumf %22, %23 : vector<64x128xf32>
    %25 = arith.truncf %24 : vector<64x128xf32> to vector<64x128xbf16>
    %cst_15 = arith.constant dense<0.000000e+00> : vector<64x128xf32>
    %26 = tpu.matmul %0, %25, %cst_15 {dimension_numbers = #tpu.dot_dimension_numbers<[1], [0], [0], [1], [0, 0, 1, 1], [], []>} : vector<64x64xbf16>, vector<64x128xbf16>, vector<64x128xf32> -> vector<64x128xf32>
    %27 = vector.broadcast %1 : vector<64x1xf32> to vector<64x128xf32>
    %28 = arith.mulf %26, %27 : vector<64x128xf32>
    %29 = arith.truncf %28 : vector<64x128xf32> to vector<64x128xbf16>
    %30 = tpu.concatenate %29, %25 in 1 : vector<64x128xbf16>, vector<64x128xbf16> -> vector<64x256xbf16>
    %c1 = arith.constant 1 : index
    %c0_16 = arith.constant 0 : index
    %c0_17 = arith.constant 0 : index
    %31 = vector.load %arg4[%c1, %c0_16, %c0_17] : memref<3x256x128xbf16, #tpu.memory_space<vmem>>, vector<1x256x128xbf16>
    %32 = vector.shape_cast %31 : vector<1x256x128xbf16> to vector<256x128xbf16>
    %cst_18 = arith.constant dense<0.000000e+00> : vector<64x128xf32>
    %33 = tpu.matmul %30, %32, %cst_18 {dimension_numbers = #tpu.dot_dimension_numbers<[1], [0], [0], [1], [0, 0, 1, 1], [], []>} : vector<64x256xbf16>, vector<256x128xbf16>, vector<64x128xf32> -> vector<64x128xf32>
    %c1_19 = arith.constant 1 : index
    %c0_20 = arith.constant 0 : index
    %c0_21 = arith.constant 0 : index
    %34 = vector.load %arg5[%c1_19, %c0_20, %c0_21] : memref<3x1x128xf32, #tpu.memory_space<vmem>>, vector<1x1x128xf32>
    %35 = vector.shape_cast %34 : vector<1x1x128xf32> to vector<1x128xf32>
    %36 = vector.broadcast %35 : vector<1x128xf32> to vector<64x128xf32>
    %37 = arith.addf %33, %36 : vector<64x128xf32>
    %38 = arith.mulf %37, %37 : vector<64x128xf32>
    %cst_22 = arith.constant dense<0.000000e+00> : vector<64xf32>
    %39 = vector.multi_reduction <add>, %38, %cst_22 [1] : vector<64x128xf32> to vector<64xf32>
    %40 = vector.shape_cast %39 : vector<64xf32> to vector<64x1xf32>
    %cst_23 = arith.constant 1.000000e-24 : f32
    %41 = vector.broadcast %cst_23 : f32 to vector<64x1xf32>
    %42 = arith.maximumf %40, %41 : vector<64x1xf32>
    %43 = math.rsqrt %42 : vector<64x1xf32>
    %44 = vector.broadcast %43 : vector<64x1xf32> to vector<64x128xf32>
    %45 = arith.mulf %37, %44 : vector<64x128xf32>
    %cst_24 = arith.constant 0.000000e+00 : f32
    %46 = vector.broadcast %cst_24 : f32 to vector<64x128xf32>
    %47 = arith.maximumf %45, %46 : vector<64x128xf32>
    %48 = arith.truncf %47 : vector<64x128xf32> to vector<64x128xbf16>
    %cst_25 = arith.constant dense<0.000000e+00> : vector<64x128xf32>
    %49 = tpu.matmul %0, %48, %cst_25 {dimension_numbers = #tpu.dot_dimension_numbers<[1], [0], [0], [1], [0, 0, 1, 1], [], []>} : vector<64x64xbf16>, vector<64x128xbf16>, vector<64x128xf32> -> vector<64x128xf32>
    %50 = vector.broadcast %1 : vector<64x1xf32> to vector<64x128xf32>
    %51 = arith.mulf %49, %50 : vector<64x128xf32>
    %52 = arith.truncf %51 : vector<64x128xf32> to vector<64x128xbf16>
    %53 = tpu.concatenate %52, %48 in 1 : vector<64x128xbf16>, vector<64x128xbf16> -> vector<64x256xbf16>
    %c2 = arith.constant 2 : index
    %c0_26 = arith.constant 0 : index
    %c0_27 = arith.constant 0 : index
    %54 = vector.load %arg4[%c2, %c0_26, %c0_27] : memref<3x256x128xbf16, #tpu.memory_space<vmem>>, vector<1x256x128xbf16>
    %55 = vector.shape_cast %54 : vector<1x256x128xbf16> to vector<256x128xbf16>
    %cst_28 = arith.constant dense<0.000000e+00> : vector<64x128xf32>
    %56 = tpu.matmul %53, %55, %cst_28 {dimension_numbers = #tpu.dot_dimension_numbers<[1], [0], [0], [1], [0, 0, 1, 1], [], []>} : vector<64x256xbf16>, vector<256x128xbf16>, vector<64x128xf32> -> vector<64x128xf32>
    %c2_29 = arith.constant 2 : index
    %c0_30 = arith.constant 0 : index
    %c0_31 = arith.constant 0 : index
    %57 = vector.load %arg5[%c2_29, %c0_30, %c0_31] : memref<3x1x128xf32, #tpu.memory_space<vmem>>, vector<1x1x128xf32>
    %58 = vector.shape_cast %57 : vector<1x1x128xf32> to vector<1x128xf32>
    %59 = vector.broadcast %58 : vector<1x128xf32> to vector<64x128xf32>
    %60 = arith.addf %56, %59 : vector<64x128xf32>
    %61 = arith.mulf %60, %60 : vector<64x128xf32>
    %cst_32 = arith.constant dense<0.000000e+00> : vector<64xf32>
    %62 = vector.multi_reduction <add>, %61, %cst_32 [1] : vector<64x128xf32> to vector<64xf32>
    %63 = vector.shape_cast %62 : vector<64xf32> to vector<64x1xf32>
    %cst_33 = arith.constant 1.000000e-24 : f32
    %64 = vector.broadcast %cst_33 : f32 to vector<64x1xf32>
    %65 = arith.maximumf %63, %64 : vector<64x1xf32>
    %66 = math.rsqrt %65 : vector<64x1xf32>
    %67 = vector.broadcast %66 : vector<64x1xf32> to vector<64x128xf32>
    %68 = arith.mulf %60, %67 : vector<64x128xf32>
    %c0_34 = arith.constant 0 : index
    %c0_35 = arith.constant 0 : index
    %69 = vector.load %arg6[%c0_34, %c0_35] : memref<64x128xf32, #tpu.memory_space<vmem>>, vector<64x128xf32>
    tpu.vector_store %arg6[%c0_34, %c0_35], %68 {strides = array<i32>} : memref<64x128xf32, #tpu.memory_space<vmem>>, vector<64x128xf32>,
    return
  }
  func.func @transform_0(%arg0: i32) -> (i32, i32) {
    %c0_i32 = arith.constant 0 : i32
    %c0_i32_0 = arith.constant 0 : i32
    %c0_i32_1 = arith.constant 0 : i32
    return %c0_i32, %c0_i32_0 : i32, i32
  }
  func.func @transform_1(%arg0: i32) -> (i32, i32) {
    %c0_i32 = arith.constant 0 : i32
    %c0_i32_0 = arith.constant 0 : i32
    %c0_i32_1 = arith.constant 0 : i32
    return %c0_i32, %c0_i32_0 : i32, i32
  }
  func.func @transform_2(%arg0: i32) -> (i32, i32) {
    %c0_i32 = arith.constant 0 : i32
    %c0_i32_0 = arith.constant 0 : i32
    %c0_i32_1 = arith.constant 0 : i32
    return %c0_i32, %c0_i32_0 : i32, i32
  }
  func.func @transform_3(%arg0: i32) -> (i32, i32, i32) {
    %c0_i32 = arith.constant 0 : i32
    %c0_i32_0 = arith.constant 0 : i32
    %c0_i32_1 = arith.constant 0 : i32
    %c0_i32_2 = arith.constant 0 : i32
    return %c0_i32, %c0_i32_0, %c0_i32_1 : i32, i32, i32
  }
  func.func @transform_4(%arg0: i32) -> (i32, i32, i32) {
    %c0_i32 = arith.constant 0 : i32
    %c0_i32_0 = arith.constant 0 : i32
    %c0_i32_1 = arith.constant 0 : i32
    %c0_i32_2 = arith.constant 0 : i32
    return %c0_i32, %c0_i32_0, %c0_i32_1 : i32, i32, i32
  }
  func.func @transform_5(%arg0: i32) -> (i32, i32) {
    %c0_i32 = arith.constant 0 : i32
    %c0_i32_0 = arith.constant 0 : i32
    %c0_i32_1 = arith.constant 0 : i32
    return %c0_i32, %c0_i32_0 : i32, i32
  }
}

</mosaic_0001>

<bundles_post_ra>
// kernel: tpu_custom_call.1
= control target key start
LH: loop header
LB: loop body
LE: loop exit
PB: predicated region body
PF: predicated region fallthrough
CT: control target
= control target key end

     0   :  { %10 = vsyncpa [#allocation3], 0  ;;  %s1871_s0 = inlined_call_operand.vmem [shape: bf16[64,64], index: 0, kind: input, shape index: {}]   ;;  %s1872_s1 = inlined_call_operand.vmem [shape: f32[64,1], index: 1, kind: input, shape index: {}]   ;;  %s1873_s2 = inlined_call_operand.vmem [shape: bf16[64,128], index: 2, kind: input, shape index: {}]   ;;  %s1874_s3 = inlined_call_operand.hbm [shape: bf16[3,256,128], index: 3, kind: input, shape index: {}]   ;;  %s1875_s4 = inlined_call_operand.vmem [shape: f32[3,1,128], index: 4, kind: input, shape index: {}]   ;;  %s1876_s5 = inlined_call_operand.hbm [shape: f32[64,128], index: 5, kind: output, shape index: {}]  }
   0x1   :  { %11 = vsyncpa [#allocation4], 0  ;;  %s1611_s18 = smov [#allocation2]   ;;  %s1563_s22 = scalar_lea.hbm %s1874_s3, 6144 }
   0x2   :  { %s23_s19 = sshll.u32 %s1611_s18, 4  ;;  %p1564_p0 = scmp.ne.s32.totalorder %s1874_s3, %s1563_s22  ;;  %s24_s19 = int_to_ptr.vmem [resolvable:$true] %s23_s19 }
   0x3   :  { %p1567_p1 = scmp.lt.u32.totalorder %s1563_s22, %s1874_s3 }
   0x5   :  { %p1569_p2 = pnand %p1567_p1, %p1564_p0 }
   0x7   :  { %1572 = shalt.err (!%p1569_p2)
}
   0x8   :  { %s1573_s27 = scalar_lea.vmem %s24_s19, 6144  ;;  %p1578_p4 = scmp.lt.s32.totalorder %s24_s19, %s24_s19 }
   0x9   :  { %p1574_p3 = scmp.ne.s32.totalorder %s24_s19, %s1573_s27  ;;  %p1579_p5 = scmp.lt.s32.totalorder %s1573_s27, %s1573_s27 }
   0xb   :  { %p1580_p6 = por %p1579_p5, %p1578_p4 }
   0xd   :  { %p1581_p7 = pnand %p1580_p6, %p1574_p3 }
   0xf   :  { %1584 = shalt.err (!%p1581_p7)
}
  0x10   :  { %s1612_s28 = smov 64   ;;  %s1613_s29 = smov 4  }
  0x11   :  { %29 = dma.hbm_to_vmem [thread:$0]  %s1874_s3, 6144, %s24_s19, [#allocation3], %s1612_s28, %s1612_s28, %s1613_s29  }
  0x12   :  { %1607 = dma.done.wait [#allocation3], 6144  }
  0x13   :  { %1608 = vsyncadd [#allocation3], 4294961152  ;;  %v1614_v0 = vmov 0   ;;  %v1459_v1 = vld [vmem:[%s1873_s2] sm:$0xff]   ;;  %v1666_v2 = vld [vmem:[%s1873_s2 + $0x8] sm:$0xff]   ;;  %vm104_vm0 = vcmask 523264  }
  0x14   :  { %1457 = vset.pattern.permute.xlu0 %v1614_v0  ;;  %1458 = vset.pattern.permute.xlu1 %v1614_v0  ;;  %v1671_v3 = vld [vmem:[%s1873_s2 + $0x10] sm:$0xff]   ;;  %v1677_v4 = vld [vmem:[%s1871_s0] sm:$0xff]   ;;  %v1688_v5 = vld [vmem:[%s1873_s2 + $0x18] sm:$0xff]  }
  0x15   :  { %1402 = vmatprep.subr.bf16.mxu1 %v1459_v1  ;;  %1410 = vmatprep.mubr.msk.bf16.mxu1 %vm104_vm0, %v1677_v4  ;;  %v44_v6 = vld [vmem:[%s1872_s1] sm:$0xff]  ;;  %v46_v7 = vld [vmem:[%s1872_s1 + $0x10] sm:$0xff]  ;;  %v45_v8 = vld [vmem:[%s1872_s1 + $0x8] sm:$0xff] }
  0x16   :  { %1403 = vmatpush3.bf16.msra.mxu1 %v1459_v1  ;;  %1426 = vmatprep.mubr.msk.bf16.mxu0 %vm104_vm0, %v1677_v4  ;;  %v47_v9 = vld [vmem:[%s1872_s1 + $0x18] sm:$0xff]  ;;  %v1707_v10 = vld [vmem:[%s1871_s0 + $0x8] sm:$0xff]   ;;  %v1467_v11 = vld [vmem:[#allocation2 + $0x40] sm:$0xff]  }
  0x17   :  { %1404 = vmatprep.subr.bf16.mxu1 %v1666_v2  ;;  %184 = vperm.xlu0 %1457, %v44_v6   ;;  %v1712_v12 = vld [vmem:[%s1871_s0 + $0x10] sm:$0xff]   ;;  %v48_v13 = vld [vmem:[%s1872_s1 + $0x20] sm:$0xff]  ;;  %v49_v14 = vld [vmem:[%s1872_s1 + $0x28] sm:$0xff] }
  0x18   :  { %194 = vperm.xlu1 %1458, %v46_v7   ;;  %v1468_v15 = vld [vmem:[#allocation2] sm:$0xff]   ;;  %v1469_v16 = vld [vmem:[#allocation2 + $0x48] sm:$0xff]   ;;  %v50_v17 = vld [vmem:[%s1872_s1 + $0x30] sm:$0xff] }
  0x19   :  { %v51_v18 = vld [vmem:[%s1872_s1 + $0x38] sm:$0xff]  ;;  %v1470_v19 = vld [vmem:[#allocation2 + $0x8] sm:$0xff]   ;;  %v1471_v21 = vld [vmem:[#allocation2 + $0x50] sm:$0xff]  }
  0x1a   :  { %1405 = vmatpush3.bf16.msra.mxu1 %v1666_v2  ;;  %v1734_v20 = vld [vmem:[%s1871_s0 + $0x18] sm:$0xff]   ;;  %v1472_v22 = vld [vmem:[#allocation2 + $0x10] sm:$0xff]   ;;  %v1475_v25 = vld [vmem:[#allocation2 + $0x60] sm:$0xff]  }
  0x1b   :  { %1406 = vmatprep.subr.bf16.mxu1 %v1671_v3  ;;  %189 = vperm.xlu0 %1457, %v45_v8   ;;  %v1473_v23 = vld [vmem:[#allocation2 + $0x58] sm:$0xff]   ;;  %v1476_v26 = vld [vmem:[#allocation2 + $0x20] sm:$0xff]   ;;  %v1477_v27 = vld [vmem:[#allocation2 + $0x68] sm:$0xff]  }
  0x1c   :  { %199 = vperm.xlu1 %1458, %v47_v9   ;;  %v1474_v24 = vld [vmem:[#allocation2 + $0x18] sm:$0xff]   ;;  %v1478_v28 = vld [vmem:[#allocation2 + $0x28] sm:$0xff]   ;;  %v1479_v29 = vld [vmem:[#allocation2 + $0x70] sm:$0xff]  }
  0x1d   :  { %v1480_v30 = vld [vmem:[#allocation2 + $0x30] sm:$0xff]   ;;  %v1481_v31 = vld [vmem:[#allocation2 + $0x78] sm:$0xff]   ;;  %v1197_v62 = vld [vmem:[%s1875_s4] ss:$0 sm:$0xff] }
  0x1e   :  { %1407 = vmatpush3.bf16.msra.mxu1 %v1671_v3  ;;  %v1482_v32 = vld [vmem:[#allocation2 + $0x38] sm:$0xff]  }
  0x1f   :  { %1408 = vmatprep.subr.bf16.mxu1 %v1688_v5  ;;  %204 = vperm.xlu0 %1457, %v48_v13  }
  0x20   :  { %209 = vperm.xlu1 %1458, %v49_v14  }
  0x22   :  { %1409 = vmatpush3.bf16.msra.mxu1 %v1688_v5 }
  0x23   :  { %1266 = vmatprep.subr.bf16.mxu1 %v1467_v11  ;;  %214 = vperm.xlu0 %1457, %v50_v17  }
  0x24   :  { %219 = vperm.xlu1 %1458, %v51_v18  }
  0x25   :  { %1411 = vmatmul.mubr.msk.bf16.vlgmr.msra.gmra.mrb[0].mxu1 %vm104_vm0, %v1707_v10 }
  0x26   :  { %1414 = vmatprep.mubr.msk.bf16.mxu1 %vm104_vm0, %v1712_v12  ;;  %1267 = vmatpush3.bf16.msra.mxu1 %v1468_v15 }
  0x27   :  { %1268 = vmatprep.subr.bf16.mxu1 %v1469_v16 }
  0x2a   :  { %1269 = vmatpush3.bf16.msra.mxu1 %v1470_v19 }
  0x2b   :  { %1270 = vmatprep.subr.bf16.mxu1 %v1471_v21 }
  0x2d   :  { %1415 = vmatmul.mubr.msk.bf16.gmra.mrb[4].mxu1 %vm104_vm0, %v1734_v20 }
  0x2e   :  { %1271 = vmatpush3.bf16.msra.mxu1 %v1472_v22  ;;  %401 = vmatprep.mubr.bf16.mxu1 %v1459_v1 }
  0x2f   :  { %1272 = vmatprep.subr.bf16.mxu1 %v1473_v23 }
  0x32   :  { %1273 = vmatpush3.bf16.msra.mxu1 %v1474_v24 }
  0x33   :  { %1274 = vmatprep.subr.bf16.mxu1 %v1475_v25 }
  0x36   :  { %1275 = vmatpush3.bf16.msra.mxu1 %v1476_v26 }
  0x37   :  { %1276 = vmatprep.subr.bf16.mxu1 %v1477_v27 }
  0x3a   :  { %1277 = vmatpush3.bf16.msra.mxu1 %v1478_v28 }
  0x3b   :  { %1278 = vmatprep.subr.bf16.mxu1 %v1479_v29 }
  0x3e   :  { %1279 = vmatpush3.bf16.msra.mxu1 %v1480_v30 }
  0x3f   :  { %1280 = vmatprep.subr.bf16.mxu1 %v1481_v31 }
  0x42   :  { %1281 = vmatpush3.bf16.msra.mxu1 %v1482_v32 }
  0x96   :  { %v1738_v33 = vpop.permute.xlu0 %184 }
  0x97   :  { %v1740_v34 = vpop.permute.xlu1 %194 }
  0x9a   :  { %v1742_v35 = vpop.permute.xlu0 %189 }
  0x9b   :  { %v1744_v36 = vpop.permute.xlu1 %199 }
  0x9e   :  { %v1746_v40 = vpop.permute.xlu0 %204 }
  0x9f   :  { %v1751_v45 = vpop.permute.xlu1 %209 }
  0xa2   :  { %v1754_v50 = vpop.permute.xlu0 %214 }
  0xa3   :  { %v1757_v52 = vpop.permute.xlu1 %219 }
  0xf8   :  { %v1412_v37 = vpop.f32.mrb[0].mxu1 }
  0xf9   :  { %v151_v38 = vpop.f32.mrb[1].mxu1  ;;  %v224_v41 = vmul.f32 %v1412_v37, %v1740_v34 }
  0xfa   :  { %v1413_v39 = vpop.f32.mrb[2].mxu1  ;;  %v222_v44 = vmul.f32 %v1738_v33, %v151_v38 }
  0xfb   :  { %v225_v42 = vmul.f32 %v1413_v39, %v1744_v36  ;;  %v154_v43 = vpop.f32.mrb[3].mxu1 }
  0xfc   :  { %v223_v46 = vmul.f32 %v1742_v35, %v154_v43 }
  0xfd   :  { %v231_v47 = vpack.c.bf16 %v225_v42, %v224_v41 }
  0xfe   :  { %v230_v48 = vpack.c.bf16 %v223_v46, %v222_v44 }
 0x100   :  { %v1416_v49 = vpop.f32.mrb[4].mxu1  ;;  %402 = vmatmul.mubr.bf16.vlgmr.msra.gmra.mrb[8].mxu1 %v230_v48 }
 0x101   :  { %v167_v51 = vpop.f32.mrb[5].mxu1  ;;  %409 = vmatprep.mubr.bf16.mxu1 %v1666_v2  ;;  %v228_v54 = vmul.f32 %v1416_v49, %v1754_v50 }
 0x102   :  { %v1417_v53 = vpop.f32.mrb[6].mxu1  ;;  %v226_v57 = vmul.f32 %v1746_v40, %v167_v51 }
 0x103   :  { %v229_v55 = vmul.f32 %v1417_v53, %v1757_v52  ;;  %v170_v56 = vpop.f32.mrb[7].mxu1 }
 0x104   :  { %v227_v58 = vmul.f32 %v1751_v45, %v170_v56 }
 0x105   :  { %v233_v59 = vpack.c.bf16 %v229_v55, %v228_v54 }
 0x106   :  { %v232_v60 = vpack.c.bf16 %v227_v58, %v226_v57 }
 0x108   :  { %410 = vmatmul.mubr.bf16.gmra.mrb[12].mxu1 %v231_v47 }
 0x109   :  { %417 = vmatprep.mubr.bf16.mxu1 %v1671_v3 }
 0x110   :  { %418 = vmatmul.mubr.bf16.gmra.mrb[16].mxu1 %v232_v60 }
 0x111   :  { %425 = vmatprep.mubr.bf16.mxu1 %v1688_v5 }
 0x118   :  { %426 = vmatmul.mubr.bf16.gmra.mrb[20].mxu1 %v233_v59 }
 0x119   :  { %1442 = vmatprep.mubr.msk.bf16.mxu1 %vm104_vm0, %v1677_v4 }
 0x1d3   :  { %v1282_v61 = vpop.f32.mrb[8].mxu1 }
 0x1d4   :  { %v1283_v63 = vpop.f32.mrb[9].mxu1 }
 0x1d5   :  { %v1284_v0 = vadd.f32 %v1283_v63, %v1282_v61  ;;  %v1285_v1 = vpop.f32.mrb[10].mxu1 }
 0x1d6   :  { %v1286_v2 = vpop.f32.mrb[11].mxu1 }
 0x1d7   :  { %v404_v6 = vadd.f32 %v1284_v0, %v1197_v62  ;;  %v1287_v7 = vadd.f32 %v1286_v2, %v1285_v1 }
 0x1d9   :  { %v407_v8 = vadd.f32 %v1287_v7, %v1197_v62  ;;  %v434_v3 = vmul.f32 %v404_v6, %v404_v6 }
 0x1db   :  { %v1288_v9 = vpop.f32.mrb[12].mxu1  ;;  %442 = vadd.xlane.f32.xlu0 %v434_v3  ;;  %v435_v5 = vmul.f32 %v407_v8, %v407_v8 }
 0x1dc   :  { %v1289_v11 = vpop.f32.mrb[13].mxu1 }
 0x1dd   :  { %v1290_v13 = vadd.f32 %v1289_v11, %v1288_v9  ;;  %v1291_v14 = vpop.f32.mrb[14].mxu1  ;;  %444 = vadd.xlane.f32.xlu1 %v435_v5 }
 0x1de   :  { %v1292_v4 = vpop.f32.mrb[15].mxu1 }
 0x1df   :  { %v412_v15 = vadd.f32 %v1290_v13, %v1197_v62  ;;  %v1293_v16 = vadd.f32 %v1292_v4, %v1291_v14 }
 0x1e1   :  { %v415_v17 = vadd.f32 %v1293_v16, %v1197_v62  ;;  %v436_v18 = vmul.f32 %v412_v15, %v412_v15 }
 0x1e3   :  { %446 = vadd.xlane.f32.xlu0 %v436_v18  ;;  %v1294_v19 = vpop.f32.mrb[16].mxu1  ;;  %v437_v24 = vmul.f32 %v415_v17, %v415_v17 }
 0x1e4   :  { %v1295_v21 = vpop.f32.mrb[17].mxu1 }
 0x1e5   :  { %v1296_v22 = vadd.f32 %v1295_v21, %v1294_v19  ;;  %v1297_v23 = vpop.f32.mrb[18].mxu1 }
 0x1e6   :  { %v1298_v25 = vpop.f32.mrb[19].mxu1 }
 0x1e7   :  { %v420_v26 = vadd.f32 %v1296_v22, %v1197_v62  ;;  %v1299_v27 = vadd.f32 %v1298_v25, %v1297_v23  ;;  %448 = vadd.xlane.f32.xlu0 %v437_v24 }
 0x1e9   :  { %v423_v28 = vadd.f32 %v1299_v27, %v1197_v62  ;;  %v438_v29 = vmul.f32 %v420_v26, %v420_v26 }
 0x1eb   :  { %v1300_v30 = vpop.f32.mrb[20].mxu1  ;;  %450 = vadd.xlane.f32.xlu1 %v438_v29  ;;  %v439_v31 = vmul.f32 %v423_v28, %v423_v28 }
 0x1ec   :  { %v1301_v32 = vpop.f32.mrb[21].mxu1 }
 0x1ed   :  { %v1302_v37 = vadd.f32 %v1301_v32, %v1300_v30  ;;  %v1303_v38 = vpop.f32.mrb[22].mxu1  ;;  %452 = vadd.xlane.f32.xlu0 %v439_v31 }
 0x1ee   :  { %v1304_v39 = vpop.f32.mrb[23].mxu1 }
 0x1ef   :  { %v428_v41 = vadd.f32 %v1302_v37, %v1197_v62  ;;  %v1305_v42 = vadd.f32 %v1304_v39, %v1303_v38  ;;  %v1483_v37 = vld [vmem:[#allocation2 + $0xc0] sm:$0xff]   ;;  %v1485_v38 = vld [vmem:[#allocation2 + $0xc8] sm:$0xff]  }
 0x1f0   :  { %v1486_v39 = vld [vmem:[#allocation2 + $0x88] sm:$0xff]  }
 0x1f1   :  { %v431_v43 = vadd.f32 %v1305_v42, %v1197_v62  ;;  %v440_v44 = vmul.f32 %v428_v41, %v428_v41  ;;  %v1488_v42 = vld [vmem:[#allocation2 + $0x90] sm:$0xff]  }
 0x1f3   :  { %454 = vadd.xlane.f32.xlu1 %v440_v44  ;;  %v441_v46 = vmul.f32 %v431_v43, %v431_v43  ;;  %v1490_v44 = vld [vmem:[#allocation2 + $0x98] sm:$0xff]  }
 0x1f5   :  { %456 = vadd.xlane.f32.xlu0 %v441_v46  ;;  %v1491_v46 = vld [vmem:[#allocation2 + $0xe0] sm:$0xff]  }
 0x268   :  { %v443_v47 = vpop.xlane.xlu0 %442 }
 0x269   :  { %v458_v48 = vmax.f32 %v443_v47, 1e-24  ;;  %v1492_v47 = vld [vmem:[#allocation2 + $0xa0] sm:$0xff]  }
 0x26a   :  { %v445_v49 = vpop.xlane.xlu1 %444 }
 0x26b   :  { %1515 = vrsqrt.f32 %v458_v48  ;;  %v459_v51 = vmax.f32 %v445_v49, 1e-24  ;;  %v1493_v48 = vld [vmem:[#allocation2 + $0xe8] sm:$0xff]  }
 0x26c   :  { %v1494_v49 = vld [vmem:[#allocation2 + $0xa8] sm:$0xff]  }
 0x26d   :  { %1517 = vrsqrt.f32 %v459_v51  ;;  %v1495_v51 = vld [vmem:[#allocation2 + $0xf0] sm:$0xff]  }
 0x270   :  { %v447_v53 = vpop.xlane.xlu0 %446 }
 0x271   :  { %v460_v54 = vmax.f32 %v447_v53, 1e-24  ;;  %v1496_v53 = vld [vmem:[#allocation2 + $0xb0] sm:$0xff]  }
 0x273   :  { %1519 = vrsqrt.f32 %v460_v54  ;;  %v1497_v54 = vld [vmem:[#allocation2 + $0xf8] sm:$0xff]  }
 0x274   :  { %v449_v55 = vpop.xlane.xlu0 %448 }
 0x275   :  { %v1516_v56 = vpop.eup %1515  ;;  %v461_v57 = vmax.f32 %v449_v55, 1e-24  ;;  %v1498_v55 = vld [vmem:[#allocation2 + $0xb8] sm:$0xff]  }
 0x276   :  { %v474_v58 = vmul.f32 %v1516_v56, %v404_v6 }
 0x277   :  { %v1518_v59 = vpop.eup %1517  ;;  %1521 = vrsqrt.f32 %v461_v57 }
 0x278   :  { %v451_v60 = vpop.xlane.xlu1 %450  ;;  %v475_v61 = vmul.f32 %v1518_v59, %v407_v8  ;;  %v482_v0 = vmax.f32 %v474_v58, 0.0 }
 0x279   :  { %v462_v62 = vmax.f32 %v451_v60, 1e-24 }
 0x27a   :  { %v453_v63 = vpop.xlane.xlu0 %452  ;;  %v483_v1 = vmax.f32 %v475_v61, 0.0 }
 0x27b   :  { %1523 = vrsqrt.f32 %v462_v62  ;;  %v463_v2 = vmax.f32 %v453_v63, 1e-24 }
 0x27c   :  { %v490_v7 = vpack.c.bf16 %v483_v1, %v482_v0 }
 0x27d   :  { %v1520_v3 = vpop.eup %1519  ;;  %1525 = vrsqrt.f32 %v463_v2 }
 0x27e   :  { %1418 = vmatprep.subr.bf16.mxu0 %v490_v7  ;;  %v476_v5 = vmul.f32 %v1520_v3, %v412_v15 }
 0x27f   :  { %1419 = vmatpush3.bf16.msra.mxu0 %v490_v7 }
 0x280   :  { %v455_v9 = vpop.xlane.xlu1 %454  ;;  %v484_v8 = vmax.f32 %v476_v5, 0.0 }
 0x281   :  { %v1522_v11 = vpop.eup %1521  ;;  %v464_v13 = vmax.f32 %v455_v9, 1e-24 }
 0x282   :  { %v457_v6 = vpop.xlane.xlu0 %456  ;;  %v477_v14 = vmul.f32 %v1522_v11, %v415_v17 }
 0x283   :  { %1527 = vrsqrt.f32 %v464_v13  ;;  %v465_v4 = vmax.f32 %v457_v6, 1e-24 }
 0x284   :  { %v485_v16 = vmax.f32 %v477_v14, 0.0 }
 0x285   :  { %v1524_v18 = vpop.eup %1523  ;;  %1529 = vrsqrt.f32 %v465_v4 }
 0x286   :  { %v1770_v19 = vpack.c.bf16 %v485_v16, %v484_v8  ;;  %v478_v21 = vmul.f32 %v1524_v18, %v420_v26  ;;  %v1219_v16 = vld [vmem:[%s1875_s4 + $0x1] ss:$0 sm:$0xff] }
 0x287   :  { %v1526_v22 = vpop.eup %1525 }
 0x288   :  { %1420 = vmatprep.subr.bf16.mxu0 %v1770_v19  ;;  %v479_v23 = vmul.f32 %v1526_v22, %v423_v28  ;;  %v486_v15 = vmax.f32 %v478_v21, 0.0  ;;  %v1484_v28 = vld [vmem:[#allocation2 + $0x80] sm:$0xff]  }
 0x289   :  { %1421 = vmatpush3.bf16.msra.mxu0 %v1770_v19 }
 0x28a   :  { %v487_v24 = vmax.f32 %v479_v23, 0.0 }
 0x28c   :  { %v1774_v25 = vpack.c.bf16 %v487_v24, %v486_v15 }
 0x28d   :  { %v1528_v17 = vpop.eup %1527 }
 0x28e   :  { %1422 = vmatprep.subr.bf16.mxu0 %v1774_v25  ;;  %v480_v27 = vmul.f32 %v1528_v17, %v428_v41  ;;  %v1487_v41 = vld [vmem:[#allocation2 + $0xd0] sm:$0xff]  }
 0x28f   :  { %v1530_v29 = vpop.eup %1529  ;;  %1423 = vmatpush3.bf16.msra.mxu0 %v1774_v25 }
 0x290   :  { %v481_v30 = vmul.f32 %v1530_v29, %v431_v43  ;;  %v488_v31 = vmax.f32 %v480_v27, 0.0  ;;  %v1489_v43 = vld [vmem:[#allocation2 + $0xd8] sm:$0xff]  }
 0x292   :  { %v489_v26 = vmax.f32 %v481_v30, 0.0 }
 0x294   :  { %v1778_v32 = vpack.c.bf16 %v489_v26, %v488_v31 }
 0x296   :  { %1424 = vmatprep.subr.bf16.mxu0 %v1778_v32 }
 0x297   :  { %1425 = vmatpush3.bf16.msra.mxu0 %v1778_v32 }
 0x298   :  { %1314 = vmatprep.subr.bf16.mxu0 %v1483_v37 }
 0x29a   :  { %1427 = vmatmul.mubr.msk.bf16.vlgmr.msra.gmra.mrb[0].mxu0 %vm104_vm0, %v1707_v10 }
 0x29b   :  { %1430 = vmatprep.mubr.msk.bf16.mxu0 %vm104_vm0, %v1712_v12  ;;  %1315 = vmatpush3.bf16.msra.mxu0 %v1484_v28 }
 0x29c   :  { %1316 = vmatprep.subr.bf16.mxu0 %v1485_v38 }
 0x29f   :  { %1317 = vmatpush3.bf16.msra.mxu0 %v1486_v39 }
 0x2a0   :  { %1318 = vmatprep.subr.bf16.mxu0 %v1487_v41 }
 0x2a2   :  { %1431 = vmatmul.mubr.msk.bf16.gmra.mrb[4].mxu0 %vm104_vm0, %v1734_v20 }
 0x2a3   :  { %740 = vmatprep.mubr.bf16.mxu0 %v490_v7  ;;  %1319 = vmatpush3.bf16.msra.mxu0 %v1488_v42 }
 0x2a4   :  { %1320 = vmatprep.subr.bf16.mxu0 %v1489_v43 }
 0x2a7   :  { %1321 = vmatpush3.bf16.msra.mxu0 %v1490_v44 }
 0x2a8   :  { %1322 = vmatprep.subr.bf16.mxu0 %v1491_v46 }
 0x2ab   :  { %1323 = vmatpush3.bf16.msra.mxu0 %v1492_v47 }
 0x2ac   :  { %1324 = vmatprep.subr.bf16.mxu0 %v1493_v48 }
 0x2af   :  { %1325 = vmatpush3.bf16.msra.mxu0 %v1494_v49 }
 0x2b0   :  { %1326 = vmatprep.subr.bf16.mxu0 %v1495_v51 }
 0x2b3   :  { %1327 = vmatpush3.bf16.msra.mxu0 %v1496_v53 }
 0x2b4   :  { %1328 = vmatprep.subr.bf16.mxu0 %v1497_v54 }
 0x2b7   :  { %1329 = vmatpush3.bf16.msra.mxu0 %v1498_v55 }
 0x36d   :  { %v1428_v56 = vpop.f32.mrb[0].mxu0 }
 0x36e   :  { %v528_v57 = vpop.f32.mrb[1].mxu0  ;;  %v561_v59 = vmul.f32 %v1428_v56, %v1740_v34 }
 0x36f   :  { %v1429_v58 = vpop.f32.mrb[2].mxu0  ;;  %v559_v62 = vmul.f32 %v528_v57, %v1738_v33 }
 0x370   :  { %v562_v60 = vmul.f32 %v1429_v58, %v1744_v36  ;;  %v531_v61 = vpop.f32.mrb[3].mxu0 }
 0x371   :  { %v560_v63 = vmul.f32 %v531_v61, %v1742_v35 }
 0x372   :  { %v568_v0 = vpack.c.bf16 %v562_v60, %v561_v59 }
 0x373   :  { %v567_v1 = vpack.c.bf16 %v560_v63, %v559_v62 }
 0x375   :  { %v1432_v2 = vpop.f32.mrb[4].mxu0  ;;  %741 = vmatmul.mubr.bf16.vlgmr.msra.gmra.mrb[8].mxu0 %v567_v1  ;;  %v1500_v1 = vld [vmem:[#allocation2 + $0x100] sm:$0xff]  }
 0x376   :  { %v544_v7 = vpop.f32.mrb[5].mxu0  ;;  %748 = vmatprep.mubr.bf16.mxu0 %v1770_v19  ;;  %v565_v9 = vmul.f32 %v1432_v2, %v1754_v50  ;;  %v1501_v2 = vld [vmem:[#allocation2 + $0x148] sm:$0xff]  }
 0x377   :  { %v1433_v3 = vpop.f32.mrb[6].mxu0  ;;  %v563_v13 = vmul.f32 %v544_v7, %v1746_v40  ;;  %v1502_v7 = vld [vmem:[#allocation2 + $0x108] sm:$0xff]  }
 0x378   :  { %v566_v5 = vmul.f32 %v1433_v3, %v1757_v52  ;;  %v547_v11 = vpop.f32.mrb[7].mxu0  ;;  %v1503_v3 = vld [vmem:[#allocation2 + $0x150] sm:$0xff]  }
 0x379   :  { %v564_v6 = vmul.f32 %v547_v11, %v1751_v45  ;;  %v1506_v11 = vld [vmem:[#allocation2 + $0x118] sm:$0xff]  }
 0x37a   :  { %v570_v14 = vpack.c.bf16 %v566_v5, %v565_v9  ;;  %v1504_v9 = vld [vmem:[#allocation2 + $0x110] sm:$0xff]   ;;  %v1505_v5 = vld [vmem:[#allocation2 + $0x158] sm:$0xff]  }
 0x37b   :  { %v569_v4 = vpack.c.bf16 %v564_v6, %v563_v13  ;;  %v1507_v13 = vld [vmem:[#allocation2 + $0x160] sm:$0xff]  }
 0x37c   :  { %v1508_v6 = vld [vmem:[#allocation2 + $0x120] sm:$0xff]  }
 0x37d   :  { %749 = vmatmul.mubr.bf16.gmra.mrb[12].mxu0 %v568_v0  ;;  %v1499_v0 = vld [vmem:[#allocation2 + $0x140] sm:$0xff]  }
 0x37e   :  { %756 = vmatprep.mubr.bf16.mxu0 %v1774_v25  ;;  %1362 = vmatprep.subr.bf16.mxu0 %v1499_v0 }
 0x37f   :  { %1363 = vmatpush3.bf16.msra.mxu0 %v1500_v1 }
 0x380   :  { %1364 = vmatprep.subr.bf16.mxu0 %v1501_v2 }
 0x383   :  { %1365 = vmatpush3.bf16.msra.mxu0 %v1502_v7 }
 0x384   :  { %1366 = vmatprep.subr.bf16.mxu0 %v1503_v3 }
 0x385   :  { %757 = vmatmul.mubr.bf16.gmra.mrb[16].mxu0 %v569_v4  ;;  %v1510_v4 = vld [vmem:[#allocation2 + $0x128] sm:$0xff]  }
 0x386   :  { %764 = vmatprep.mubr.bf16.mxu0 %v1778_v32 }
 0x387   :  { %1367 = vmatpush3.bf16.msra.mxu0 %v1504_v9 }
 0x388   :  { %1368 = vmatprep.subr.bf16.mxu0 %v1505_v5 }
 0x38b   :  { %1369 = vmatpush3.bf16.msra.mxu0 %v1506_v11 }
 0x38c   :  { %1370 = vmatprep.subr.bf16.mxu0 %v1507_v13 }
 0x38d   :  { %765 = vmatmul.mubr.bf16.gmra.mrb[20].mxu0 %v570_v14  ;;  %v1509_v14 = vld [vmem:[#allocation2 + $0x168] sm:$0xff]  }
 0x38f   :  { %1371 = vmatpush3.bf16.msra.mxu0 %v1508_v6 }
 0x390   :  { %1372 = vmatprep.subr.bf16.mxu0 %v1509_v14 }
 0x393   :  { %1373 = vmatpush3.bf16.msra.mxu0 %v1510_v4 }
 0x448   :  { %v1330_v8 = vpop.f32.mrb[8].mxu0 }
 0x449   :  { %v1331_v18 = vpop.f32.mrb[9].mxu0 }
 0x44a   :  { %v1332_v19 = vadd.f32 %v1331_v18, %v1330_v8  ;;  %v1333_v21 = vpop.f32.mrb[10].mxu0 }
 0x44b   :  { %v1334_v22 = vpop.f32.mrb[11].mxu0 }
 0x44c   :  { %v1802_v23 = vadd.f32 %v1332_v19, %v1219_v16  ;;  %v1335_v15 = vadd.f32 %v1334_v22, %v1333_v21 }
 0x44e   :  { %v1804_v24 = vadd.f32 %v1335_v15, %v1219_v16  ;;  %v773_v25 = vmul.f32 %v1802_v23, %v1802_v23 }
 0x450   :  { %v1336_v17 = vpop.f32.mrb[12].mxu0  ;;  %781 = vadd.xlane.f32.xlu1 %v773_v25  ;;  %v774_v27 = vmul.f32 %v1804_v24, %v1804_v24 }
 0x451   :  { %v1337_v29 = vpop.f32.mrb[13].mxu0 }
 0x452   :  { %v1338_v30 = vadd.f32 %v1337_v29, %v1336_v17  ;;  %v1339_v31 = vpop.f32.mrb[14].mxu0  ;;  %783 = vadd.xlane.f32.xlu0 %v774_v27 }
 0x453   :  { %v1340_v26 = vpop.f32.mrb[15].mxu0 }
 0x454   :  { %v1810_v32 = vadd.f32 %v1338_v30, %v1219_v16  ;;  %v1341_v37 = vadd.f32 %v1340_v26, %v1339_v31 }
 0x456   :  { %v1812_v28 = vadd.f32 %v1341_v37, %v1219_v16  ;;  %v775_v38 = vmul.f32 %v1810_v32, %v1810_v32 }
 0x458   :  { %785 = vadd.xlane.f32.xlu1 %v775_v38  ;;  %v1342_v39 = vpop.f32.mrb[16].mxu0  ;;  %v776_v41 = vmul.f32 %v1812_v28, %v1812_v28 }
 0x459   :  { %v1343_v42 = vpop.f32.mrb[17].mxu0 }
 0x45a   :  { %v1344_v43 = vadd.f32 %v1343_v42, %v1342_v39  ;;  %787 = vadd.xlane.f32.xlu0 %v776_v41  ;;  %v1345_v44 = vpop.f32.mrb[18].mxu0 }
 0x45b   :  { %v1346_v46 = vpop.f32.mrb[19].mxu0 }
 0x45c   :  { %v1818_v47 = vadd.f32 %v1344_v43, %v1219_v16  ;;  %v1347_v48 = vadd.f32 %v1346_v46, %v1345_v44 }
 0x45e   :  { %v1820_v49 = vadd.f32 %v1347_v48, %v1219_v16  ;;  %v777_v51 = vmul.f32 %v1818_v47, %v1818_v47 }
 0x460   :  { %v1348_v53 = vpop.f32.mrb[20].mxu0  ;;  %789 = vadd.xlane.f32.xlu1 %v777_v51  ;;  %v778_v54 = vmul.f32 %v1820_v49, %v1820_v49 }
 0x461   :  { %v1349_v55 = vpop.f32.mrb[21].mxu0 }
 0x462   :  { %v1350_v56 = vadd.f32 %v1349_v55, %v1348_v53  ;;  %v1351_v57 = vpop.f32.mrb[22].mxu0  ;;  %791 = vadd.xlane.f32.xlu0 %v778_v54 }
 0x463   :  { %v1352_v58 = vpop.f32.mrb[23].mxu0 }
 0x464   :  { %v1826_v59 = vadd.f32 %v1350_v56, %v1219_v16  ;;  %v1353_v60 = vadd.f32 %v1352_v58, %v1351_v57 }
 0x466   :  { %v1828_v61 = vadd.f32 %v1353_v60, %v1219_v16  ;;  %v779_v62 = vmul.f32 %v1826_v59, %v1826_v59 }
 0x468   :  { %793 = vadd.xlane.f32.xlu1 %v779_v62  ;;  %v780_v63 = vmul.f32 %v1828_v61, %v1828_v61 }
 0x46a   :  { %795 = vadd.xlane.f32.xlu0 %v780_v63 }
 0x4dd   :  { %v782_v8 = vpop.xlane.xlu1 %781 }
 0x4de   :  { %v797_v16 = vmax.f32 %v782_v8, 1e-24 }
 0x4df   :  { %v784_v18 = vpop.xlane.xlu0 %783 }
 0x4e0   :  { %1531 = vrsqrt.f32 %v797_v16  ;;  %v798_v19 = vmax.f32 %v784_v18, 1e-24 }
 0x4e2   :  { %1533 = vrsqrt.f32 %v798_v19 }
 0x4e5   :  { %v786_v21 = vpop.xlane.xlu1 %785 }
 0x4e6   :  { %v799_v22 = vmax.f32 %v786_v21, 1e-24 }
 0x4e7   :  { %v788_v15 = vpop.xlane.xlu0 %787 }
 0x4e8   :  { %1535 = vrsqrt.f32 %v799_v22  ;;  %v800_v25 = vmax.f32 %v788_v15, 1e-24 }
 0x4ea   :  { %v1532_v17 = vpop.eup %1531  ;;  %1537 = vrsqrt.f32 %v800_v25 }
 0x4eb   :  { %v813_v27 = vmul.f32 %v1532_v17, %v1802_v23 }
 0x4ec   :  { %v1534_v29 = vpop.eup %1533 }
 0x4ed   :  { %v790_v30 = vpop.xlane.xlu1 %789  ;;  %v814_v31 = vmul.f32 %v1534_v29, %v1804_v24  ;;  %v821_v38 = vmax.f32 %v813_v27, 0.0  ;;  %v1241_v27 = vld [vmem:[%s1875_s4 + $0x2] ss:$0 sm:$0xff]  ;;  %s1615_s4 = smov [#allocation5]  }
 0x4ee   :  { %v801_v26 = vmax.f32 %v790_v30, 1e-24  ;;  %s1173_s15 = sshll.u32 %s1615_s4, 4  ;;  %s1174_s15 = int_to_ptr.vmem [resolvable:$true] %s1173_s15 }
 0x4ef   :  { %v792_v37 = vpop.xlane.xlu0 %791  ;;  %v822_v39 = vmax.f32 %v814_v31, 0.0  ;;  %s1585_s16 = scalar_lea.vmem %s1174_s15, 1024  ;;  %p1590_p9 = scmp.lt.s32.totalorder %s1174_s15, %s1174_s15 }
 0x4f0   :  { %1539 = vrsqrt.f32 %v801_v26  ;;  %v802_v41 = vmax.f32 %v792_v37, 1e-24  ;;  %p1586_p8 = scmp.ne.s32.totalorder %s1174_s15, %s1585_s16  ;;  %p1591_p10 = scmp.lt.s32.totalorder %s1585_s16, %s1585_s16 }
 0x4f1   :  { %v829_v42 = vpack.c.bf16 %v822_v39, %v821_v38 }
 0x4f2   :  { %v1536_v43 = vpop.eup %1535  ;;  %1541 = vrsqrt.f32 %v802_v41  ;;  %p1592_p11 = por %p1591_p10, %p1590_p9 }
 0x4f3   :  { %1434 = vmatprep.subr.bf16.mxu1 %v829_v42  ;;  %1079 = vmatprep.mubr.bf16.mxu0 %v829_v42  ;;  %v815_v44 = vmul.f32 %v1536_v43, %v1810_v32 }
 0x4f4   :  { %v1538_v46 = vpop.eup %1537  ;;  %1435 = vmatpush3.bf16.msra.mxu1 %v829_v42  ;;  %p1593_p12 = pnand %p1592_p11, %p1586_p8 }
 0x4f5   :  { %v794_v23 = vpop.xlane.xlu1 %793  ;;  %v816_v48 = vmul.f32 %v1538_v46, %v1812_v28  ;;  %v823_v53 = vmax.f32 %v815_v44, 0.0 }
 0x4f6   :  { %v803_v51 = vmax.f32 %v794_v23, 1e-24 }
 0x4f7   :  { %v796_v24 = vpop.xlane.xlu0 %795  ;;  %v824_v54 = vmax.f32 %v816_v48, 0.0 }
 0x4f8   :  { %1543 = vrsqrt.f32 %v803_v51  ;;  %v804_v55 = vmax.f32 %v796_v24, 1e-24 }
 0x4f9   :  { %v830_v56 = vpack.c.bf16 %v824_v54, %v823_v53 }
 0x4fa   :  { %v1540_v57 = vpop.eup %1539  ;;  %1545 = vrsqrt.f32 %v804_v55 }
 0x4fb   :  { %1436 = vmatprep.subr.bf16.mxu1 %v830_v56  ;;  %v817_v58 = vmul.f32 %v1540_v57, %v1818_v47  ;;  %v1511_v47 = vld [vmem:[#allocation2 + $0x170] sm:$0xff]  }
 0x4fc   :  { %v1542_v60 = vpop.eup %1541  ;;  %1437 = vmatpush3.bf16.msra.mxu1 %v830_v56  ;;  %1374 = vmatprep.subr.bf16.mxu0 %v1511_v47 }
 0x4fd   :  { %v818_v32 = vmul.f32 %v1542_v60, %v1820_v49  ;;  %v825_v62 = vmax.f32 %v817_v58, 0.0  ;;  %v1512_v49 = vld [vmem:[#allocation2 + $0x130] sm:$0xff]  }
 0x4fe   :  { %1375 = vmatpush3.bf16.msra.mxu0 %v1512_v49 }
 0x4ff   :  { %v826_v63 = vmax.f32 %v818_v32, 0.0 }
 0x501   :  { %v831_v0 = vpack.c.bf16 %v826_v63, %v825_v62 }
 0x502   :  { %v1544_v28 = vpop.eup %1543 }
 0x503   :  { %1438 = vmatprep.subr.bf16.mxu1 %v831_v0  ;;  %v819_v1 = vmul.f32 %v1544_v28, %v1826_v59  ;;  %v1513_v59 = vld [vmem:[#allocation2 + $0x178] sm:$0xff]  }
 0x504   :  { %v1546_v2 = vpop.eup %1545  ;;  %1439 = vmatpush3.bf16.msra.mxu1 %v831_v0  ;;  %1376 = vmatprep.subr.bf16.mxu0 %v1513_v59 }
 0x505   :  { %v820_v7 = vmul.f32 %v1546_v2, %v1828_v61  ;;  %v827_v3 = vmax.f32 %v819_v1, 0.0  ;;  %v1514_v61 = vld [vmem:[#allocation2 + $0x138] sm:$0xff]  }
 0x506   :  { %1377 = vmatpush3.bf16.msra.mxu0 %v1514_v61 }
 0x507   :  { %v828_v9 = vmax.f32 %v820_v7, 0.0 }
 0x509   :  { %v832_v5 = vpack.c.bf16 %v828_v9, %v827_v3 }
 0x50b   :  { %1440 = vmatprep.subr.bf16.mxu1 %v832_v5 }
 0x50c   :  { %1441 = vmatpush3.bf16.msra.mxu1 %v832_v5 }
 0x50f   :  { %1443 = vmatmul.mubr.msk.bf16.vlgmr.msra.gmra.mrb[24].mxu1 %vm104_vm0, %v1707_v10 }
 0x510   :  { %1446 = vmatprep.mubr.msk.bf16.mxu1 %vm104_vm0, %v1712_v12 }
 0x517   :  { %1447 = vmatmul.mubr.msk.bf16.gmra.mrb[28].mxu1 %vm104_vm0, %v1734_v20 }
 0x5e2   :  { %v1444_v11 = vpop.f32.mrb[24].mxu1 }
 0x5e3   :  { %v867_v13 = vpop.f32.mrb[25].mxu1  ;;  %v900_v14 = vmul.f32 %v1444_v11, %v1740_v34 }
 0x5e4   :  { %v1445_v6 = vpop.f32.mrb[26].mxu1  ;;  %v898_v12 = vmul.f32 %v867_v13, %v1738_v33 }
 0x5e5   :  { %v901_v10 = vmul.f32 %v1445_v6, %v1744_v36  ;;  %v870_v4 = vpop.f32.mrb[27].mxu1 }
 0x5e6   :  { %v899_v20 = vmul.f32 %v870_v4, %v1742_v35 }
 0x5e7   :  { %v907_v8 = vpack.c.bf16 %v901_v10, %v900_v14 }
 0x5e8   :  { %v906_v16 = vpack.c.bf16 %v899_v20, %v898_v12 }
 0x5ea   :  { %v1448_v18 = vpop.f32.mrb[28].mxu1  ;;  %1080 = vmatmul.mubr.bf16.vlgmr.msra.gmra.mrb[24].mxu0 %v906_v16 }
 0x5eb   :  { %v883_v19 = vpop.f32.mrb[29].mxu1  ;;  %1087 = vmatprep.mubr.bf16.mxu0 %v830_v56  ;;  %v904_v22 = vmul.f32 %v1448_v18, %v1754_v50 }
 0x5ec   :  { %v1449_v21 = vpop.f32.mrb[30].mxu1  ;;  %v902_v34 = vmul.f32 %v883_v19, %v1746_v40 }
 0x5ed   :  { %v905_v15 = vmul.f32 %v1449_v21, %v1757_v52  ;;  %v886_v25 = vpop.f32.mrb[31].mxu1 }
 0x5ee   :  { %v903_v36 = vmul.f32 %v886_v25, %v1751_v45 }
 0x5ef   :  { %v909_v17 = vpack.c.bf16 %v905_v15, %v904_v22 }
 0x5f0   :  { %v908_v33 = vpack.c.bf16 %v903_v36, %v902_v34 }
 0x5f2   :  { %1088 = vmatmul.mubr.bf16.gmra.mrb[28].mxu0 %v907_v8 }
 0x5f3   :  { %1095 = vmatprep.mubr.bf16.mxu0 %v831_v0 }
 0x5fa   :  { %1096 = vmatmul.mubr.bf16.gmra.mrb[32].mxu0 %v908_v33 }
 0x5fb   :  { %1103 = vmatprep.mubr.bf16.mxu0 %v832_v5 }
 0x602   :  { %1104 = vmatmul.mubr.bf16.gmra.mrb[36].mxu0 %v909_v17 }
 0x6bd   :  { %v1378_v35 = vpop.f32.mrb[24].mxu0 }
 0x6be   :  { %v1379_v50 = vpop.f32.mrb[25].mxu0 }
 0x6bf   :  { %v1380_v29 = vadd.f32 %v1379_v50, %v1378_v35  ;;  %v1381_v52 = vpop.f32.mrb[26].mxu0 }
 0x6c0   :  { %v1382_v30 = vpop.f32.mrb[27].mxu0 }
 0x6c1   :  { %v1082_v31 = vadd.f32 %v1380_v29, %v1241_v27  ;;  %v1383_v40 = vadd.f32 %v1382_v30, %v1381_v52 }
 0x6c3   :  { %v1085_v26 = vadd.f32 %v1383_v40, %v1241_v27  ;;  %v1112_v45 = vmul.f32 %v1082_v31, %v1082_v31 }
 0x6c5   :  { %v1384_v37 = vpop.f32.mrb[28].mxu0  ;;  %1120 = vadd.xlane.f32.xlu1 %v1112_v45  ;;  %v1113_v38 = vmul.f32 %v1085_v26, %v1085_v26 }
 0x6c6   :  { %v1385_v39 = vpop.f32.mrb[29].mxu0 }
 0x6c7   :  { %v1386_v41 = vadd.f32 %v1385_v39, %v1384_v37  ;;  %v1387_v42 = vpop.f32.mrb[30].mxu0  ;;  %1122 = vadd.xlane.f32.xlu0 %v1113_v38 }
 0x6c8   :  { %v1388_v43 = vpop.f32.mrb[31].mxu0 }
 0x6c9   :  { %v1090_v44 = vadd.f32 %v1386_v41, %v1241_v27  ;;  %v1389_v46 = vadd.f32 %v1388_v43, %v1387_v42 }
 0x6cb   :  { %v1093_v23 = vadd.f32 %v1389_v46, %v1241_v27  ;;  %v1114_v48 = vmul.f32 %v1090_v44, %v1090_v44 }
 0x6cd   :  { %1124 = vadd.xlane.f32.xlu1 %v1114_v48  ;;  %v1390_v51 = vpop.f32.mrb[32].mxu0  ;;  %v1115_v24 = vmul.f32 %v1093_v23, %v1093_v23 }
 0x6ce   :  { %v1391_v53 = vpop.f32.mrb[33].mxu0 }
 0x6cf   :  { %v1392_v54 = vadd.f32 %v1391_v53, %v1390_v51  ;;  %1126 = vadd.xlane.f32.xlu0 %v1115_v24  ;;  %v1393_v55 = vpop.f32.mrb[34].mxu0 }
 0x6d0   :  { %v1394_v56 = vpop.f32.mrb[35].mxu0 }
 0x6d1   :  { %v1098_v57 = vadd.f32 %v1392_v54, %v1241_v27  ;;  %v1395_v58 = vadd.f32 %v1394_v56, %v1393_v55 }
 0x6d3   :  { %v1101_v60 = vadd.f32 %v1395_v58, %v1241_v27  ;;  %v1116_v32 = vmul.f32 %v1098_v57, %v1098_v57 }
 0x6d5   :  { %v1396_v62 = vpop.f32.mrb[36].mxu0  ;;  %1128 = vadd.xlane.f32.xlu1 %v1116_v32  ;;  %v1117_v63 = vmul.f32 %v1101_v60, %v1101_v60 }
 0x6d6   :  { %v1397_v0 = vpop.f32.mrb[37].mxu0 }
 0x6d7   :  { %v1398_v28 = vadd.f32 %v1397_v0, %v1396_v62  ;;  %v1399_v1 = vpop.f32.mrb[38].mxu0  ;;  %1130 = vadd.xlane.f32.xlu0 %v1117_v63 }
 0x6d8   :  { %v1400_v2 = vpop.f32.mrb[39].mxu0 }
 0x6d9   :  { %v1106_v7 = vadd.f32 %v1398_v28, %v1241_v27  ;;  %v1401_v3 = vadd.f32 %v1400_v2, %v1399_v1 }
 0x6db   :  { %v1109_v9 = vadd.f32 %v1401_v3, %v1241_v27  ;;  %v1118_v5 = vmul.f32 %v1106_v7, %v1106_v7 }
 0x6dd   :  { %1132 = vadd.xlane.f32.xlu1 %v1118_v5  ;;  %v1119_v47 = vmul.f32 %v1109_v9, %v1109_v9 }
 0x6df   :  { %1134 = vadd.xlane.f32.xlu0 %v1119_v47 }
 0x752   :  { %v1121_v49 = vpop.xlane.xlu1 %1120 }
 0x753   :  { %v1136_v59 = vmax.f32 %v1121_v49, 1e-24 }
 0x754   :  { %v1123_v61 = vpop.xlane.xlu0 %1122 }
 0x755   :  { %1547 = vrsqrt.f32 %v1136_v59  ;;  %v1137_v11 = vmax.f32 %v1123_v61, 1e-24 }
 0x757   :  { %1549 = vrsqrt.f32 %v1137_v11 }
 0x75a   :  { %v1125_v13 = vpop.xlane.xlu1 %1124 }
 0x75b   :  { %v1138_v6 = vmax.f32 %v1125_v13, 1e-24 }
 0x75c   :  { %v1127_v14 = vpop.xlane.xlu0 %1126 }
 0x75d   :  { %1551 = vrsqrt.f32 %v1138_v6  ;;  %v1139_v10 = vmax.f32 %v1127_v14, 1e-24 }
 0x75f   :  { %v1548_v4 = vpop.eup %1547  ;;  %1553 = vrsqrt.f32 %v1139_v10 }
 0x760   :  { %v1152_v12 = vmul.f32 %v1548_v4, %v1082_v31 }
 0x761   :  { %v1550_v20 = vpop.eup %1549 }
 0x762   :  { %1160 = vst [vmem:[#allocation5] sm:$0xff] %v1152_v12  ;;  %v1153_v8 = vmul.f32 %v1550_v20, %v1085_v26  ;;  %v1129_v16 = vpop.xlane.xlu1 %1128 }
 0x763   :  { %v1140_v18 = vmax.f32 %v1129_v16, 1e-24 }
 0x764   :  { %1161 = vst [vmem:[#allocation5 + $0x8] sm:$0xff] %v1153_v8  ;;  %v1131_v19 = vpop.xlane.xlu0 %1130 }
 0x765   :  { %1555 = vrsqrt.f32 %v1140_v18  ;;  %v1141_v21 = vmax.f32 %v1131_v19, 1e-24 }
 0x767   :  { %v1552_v22 = vpop.eup %1551  ;;  %1557 = vrsqrt.f32 %v1141_v21 }
 0x768   :  { %v1154_v15 = vmul.f32 %v1552_v22, %v1090_v44 }
 0x769   :  { %v1554_v25 = vpop.eup %1553 }
 0x76a   :  { %1162 = vst [vmem:[#allocation5 + $0x10] sm:$0xff] %v1154_v15  ;;  %v1155_v34 = vmul.f32 %v1554_v25, %v1093_v23  ;;  %v1133_v36 = vpop.xlane.xlu1 %1132 }
 0x76b   :  { %v1142_v17 = vmax.f32 %v1133_v36, 1e-24 }
 0x76c   :  { %1163 = vst [vmem:[#allocation5 + $0x18] sm:$0xff] %v1155_v34  ;;  %v1135_v33 = vpop.xlane.xlu0 %1134 }
 0x76d   :  { %1559 = vrsqrt.f32 %v1142_v17  ;;  %v1143_v35 = vmax.f32 %v1135_v33, 1e-24 }
 0x76f   :  { %v1556_v27 = vpop.eup %1555  ;;  %1561 = vrsqrt.f32 %v1143_v35 }
 0x770   :  { %v1156_v50 = vmul.f32 %v1556_v27, %v1098_v57 }
 0x771   :  { %v1558_v29 = vpop.eup %1557 }
 0x772   :  { %1164 = vst [vmem:[#allocation5 + $0x20] sm:$0xff] %v1156_v50  ;;  %v1157_v52 = vmul.f32 %v1558_v29, %v1101_v60 }
 0x774   :  { %1165 = vst [vmem:[#allocation5 + $0x28] sm:$0xff] %v1157_v52 }
 0x777   :  { %v1560_v30 = vpop.eup %1559 }
 0x778   :  { %v1158_v31 = vmul.f32 %v1560_v30, %v1106_v7 }
 0x779   :  { %v1562_v40 = vpop.eup %1561 }
 0x77a   :  { %1166 = vst [vmem:[#allocation5 + $0x30] sm:$0xff] %v1158_v31  ;;  %v1159_v26 = vmul.f32 %v1562_v40, %v1109_v9 }
 0x77c   :  { %1167 = vst [vmem:[#allocation5 + $0x38] sm:$0xff] %v1159_v26 }
 0x77d   :  { %1596 = shalt.err (!%p1593_p12)
}
 0x77e   :  { %s1597_s19 = scalar_lea.hbm %s1876_s5, 1024 }
 0x77f   :  { %p1598_p13 = scmp.ne.s32.totalorder %s1876_s5, %s1597_s19  ;;  %p1601_p0 = scmp.lt.u32.totalorder %s1597_s19, %s1876_s5 }
 0x781   :  { %p1603_p1 = pnand %p1601_p0, %p1598_p13 }
 0x783   :  { %1606 = shalt.err (!%p1603_p1)
}
 0x784   :  { %s1616_s2 = smov 128   ;;  %s1617_s24 = smov 8  }
 0x785   :  { %1179 = dma.vmem_to_hbm [thread:$0]  %s1174_s15, 1024, %s1876_s5, [#allocation4], %s1616_s2, %s1616_s2, %s1617_s24  }
 0x786   :  { %1609 = dma.done.wait [#allocation4], 1024  }
 0x787   :  { %1610 = vsyncadd [#allocation4], 4294966272 }
 0x788   :  { %1183 = vsyncpa [#allocation3], 1 }
 0x789   :  { %1184 = vsyncpa [#allocation4], 1 }

</bundles_post_ra>
